<compile_context>
chip_gen: v7x
topology: tpu7x:2x2x1
jax: 0.10.0
libtpu: 0.0.40
codegen_flags: <defaults>
</compile_context>

<pallas_src>
import functools

import jax
import jax.numpy as jnp
from jax.experimental import pallas as pl
from jax.experimental.pallas import tpu as pltpu

LANES = 128
TM_MAX = 1024   # rows per grid step; (1024,128) f32 block = 512 KiB per input
NCORES = 2      # leading "parallel" grid axis -> both TensorCores on v7x


def _masked_l1_kernel(pred_ref, tgt_ref, sum_ref, cnt_ref, acc_sum, acc_cnt,
                      *, tm, rows_total, tiles_per_core):
    c = pl.program_id(0)   # per-core partial index ("parallel")
    i = pl.program_id(1)   # reduction step within this core ("arbitrary")

    @pl.when(i == 0)
    def _():
        acc_sum[...] = jnp.zeros_like(acc_sum)
        acc_cnt[...] = jnp.zeros_like(acc_cnt)

    # Cast in-kernel (inputs stay in native dtype in HBM).
    t = tgt_ref[...].astype(jnp.float32)
    p = pred_ref[...].astype(jnp.float32)

    # Mask rows past the real end of the array (partial / clamped tail tiles).
    g = c * tiles_per_core + i                 # global tile index
    row_ids = g * tm + jax.lax.broadcasted_iota(jnp.int32, (tm, LANES), 0)
    valid = jnp.logical_and(t > 0.0, row_ids < rows_total)

    diff = jnp.abs(t - p)
    acc_sum[...] += jnp.where(valid, diff, 0.0)
    acc_cnt[...] += valid.astype(jnp.int32)

    # Single cross-lane reduce + store per core, only on the last step.
    @pl.when(i == tiles_per_core - 1)
    def _():
        sum_ref[...] = jnp.broadcast_to(jnp.sum(acc_sum[...]), sum_ref.shape)
        cnt_ref[...] = jnp.broadcast_to(jnp.sum(acc_cnt[...]), cnt_ref.shape)


def masked_l1_loss(pred, target):
    """Pallas implementation of MaskedL1Loss.forward(pred, target)."""
    assert pred.ndim == target.ndim, "inconsistent dimensions"
    assert pred.shape == target.shape

    n = pred.size
    if n == 0:
        return jnp.float32(jnp.nan)

    # Flatten in native dtype (reshape is free; no extra HBM pass).
    p = pred.reshape(-1)
    t = target.reshape(-1)

    # Only pad when n is not a lane multiple (padded target=0 -> masked out).
    rem = n % LANES
    if rem:
        pad = LANES - rem
        p = jnp.pad(p, (0, pad))
        t = jnp.pad(t, (0, pad))

    rows = p.shape[0] // LANES
    p2 = p.reshape(rows, LANES)
    t2 = t.reshape(rows, LANES)

    tm = rows if rows <= TM_MAX else TM_MAX          # full dim or multiple of 8
    num_tiles = pl.cdiv(rows, tm)
    ncores = NCORES if num_tiles >= NCORES else 1
    tiles_per_core = pl.cdiv(num_tiles, ncores)

    kernel = functools.partial(
        _masked_l1_kernel, tm=tm, rows_total=rows, tiles_per_core=tiles_per_core
    )

    def in_map(c, i):
        g = c * tiles_per_core + i
        # Clamp tiles past the end (their rows are masked out in-kernel).
        return (jnp.minimum(g, num_tiles - 1), 0)

    grid_spec = pltpu.PrefetchScalarGridSpec(
        num_scalar_prefetch=0,
        grid=(ncores, tiles_per_core),
        in_specs=[
            pl.BlockSpec((tm, LANES), in_map),
            pl.BlockSpec((tm, LANES), in_map),
        ],
        out_specs=[
            pl.BlockSpec((8, LANES), lambda c, i: (c, 0)),
            pl.BlockSpec((8, LANES), lambda c, i: (c, 0)),
        ],
        scratch_shapes=[
            pltpu.VMEM((tm, LANES), jnp.float32),   # per-core sum partials
            pltpu.VMEM((tm, LANES), jnp.int32),     # per-core count partials
        ],
    )

    sums, cnts = pl.pallas_call(
        kernel,
        out_shape=(
            jax.ShapeDtypeStruct((ncores * 8, LANES), jnp.float32),
            jax.ShapeDtypeStruct((ncores * 8, LANES), jnp.int32),
        ),
        grid_spec=grid_spec,
        compiler_params=pltpu.CompilerParams(
            dimension_semantics=("parallel", "arbitrary"),
        ),
    )(p2, t2)

    # Each core's (8,128) block is filled with its partial; pick one element
    # per core and combine.  (0 valid pixels -> 0/0 -> NaN, matching torch.)
    total_sum = jnp.sum(sums[0::8, 0])
    total_cnt = jnp.sum(cnts[0::8, 0])
    return total_sum / total_cnt.astype(jnp.float32)


def masked_l1_loss_ref(pred, target):
    p = pred.astype(jnp.float32)
    t = target.astype(jnp.float32)
    mask = t > 0.0
    diff = jnp.abs(t - p)
    return jnp.sum(jnp.where(mask, diff, 0.0)) / jnp.sum(mask.astype(jnp.float32))


def _make_inputs(key, shape):
    k1, k2 = jax.random.split(key)
    pred = jax.random.normal(k1, shape, dtype=jnp.float32)
    # target: mixture of positive depths and zeros (invalid pixels)
    target = jax.random.uniform(k2, shape, dtype=jnp.float32,
                                minval=-0.5, maxval=2.0)
    target = jnp.where(target > 0.0, target, 0.0)
    return pred, target


if __name__ == "__main__":
    key = jax.random.PRNGKey(0)

    # Primary small NCHW case (matches typical module usage).
    k0, k1, k2 = jax.random.split(key, 3)
    pred, target = _make_inputs(k0, (2, 4, 16, 16))
    loss = masked_l1_loss(pred, target)
    jax.block_until_ready(loss)
    ref = masked_l1_loss_ref(pred, target)
    assert jnp.allclose(loss, ref, rtol=1e-4, atol=1e-6), (loss, ref)

    # Ragged element count (exercises the lane-pad fallback path).
    pred, target = _make_inputs(k1, (3, 5, 7, 11))
    loss = masked_l1_loss(pred, target)
    jax.block_until_ready(loss)
    ref = masked_l1_loss_ref(pred, target)
    assert jnp.allclose(loss, ref, rtol=1e-4, atol=1e-6), (loss, ref)

    # Multi-tile case (exercises big tiles, partial tail tile, 2-core split).
    pred, target = _make_inputs(k2, (2, 8, 128, 130))
    loss = masked_l1_loss(pred, target)
    jax.block_until_ready(loss)
    ref = masked_l1_loss_ref(pred, target)
    assert jnp.allclose(loss, ref, rtol=1e-4, atol=1e-6), (loss, ref)

    print("KERNEL_OK")
</pallas_src>

<mosaic_0001>
module attributes {stable_mosaic.version = 11 : i64} {
  func.func @_masked_l1_kernel(%arg0: i32, %arg1: i32, %arg2: memref<16x128xf32, #tpu.memory_space<vmem>>, %arg3: memref<16x128xf32, #tpu.memory_space<vmem>>, %arg4: memref<8x128xf32, #tpu.memory_space<vmem>>, %arg5: memref<8x128xi32, #tpu.memory_space<vmem>>, %arg6: memref<16x128xf32, #tpu.memory_space<vmem>>, %arg7: memref<16x128xi32, #tpu.memory_space<vmem>>) attributes {dimension_semantics = [#tpu.dimension_semantics<parallel>, #tpu.dimension_semantics<arbitrary>], iteration_bounds = array<i64: 1, 1>, scalar_prefetch = 0 : i64, scratch_operands = 2 : i64, tpu.core_type = #tpu.core_type<tc>, window_params = [{transform_indices = @transform_0, window_bounds = array<i64: 16, 128>}, {transform_indices = @transform_1, window_bounds = array<i64: 16, 128>}, {transform_indices = @transform_2, window_bounds = array<i64: 8, 128>}, {transform_indices = @transform_3, window_bounds = array<i64: 8, 128>}]} {
    %c0_i32 = arith.constant 0 : i32
    %0 = arith.cmpi eq, %arg1, %c0_i32 : i32
    %1 = arith.extui %0 : i1 to i32
    %c0_i32_0 = arith.constant 0 : i32
    %2 = arith.cmpi ne, %1, %c0_i32_0 : i32
    scf.if %2 {
      %cst_16 = arith.constant 0.000000e+00 : f32
      %30 = vector.broadcast %cst_16 : f32 to vector<16x128xf32>
      %c0_17 = arith.constant 0 : index
      %c0_18 = arith.constant 0 : index
      %31 = vector.load %arg6[%c0_17, %c0_18] : memref<16x128xf32, #tpu.memory_space<vmem>>, vector<16x128xf32>
      tpu.vector_store %arg6[%c0_17, %c0_18], %30 {strides = array<i32>} : memref<16x128xf32, #tpu.memory_space<vmem>>, vector<16x128xf32>,
      %c0_i32_19 = arith.constant 0 : i32
      %32 = vector.broadcast %c0_i32_19 : i32 to vector<16x128xi32>
      %c0_20 = arith.constant 0 : index
      %c0_21 = arith.constant 0 : index
      %33 = vector.load %arg7[%c0_20, %c0_21] : memref<16x128xi32, #tpu.memory_space<vmem>>, vector<16x128xi32>
      tpu.vector_store %arg7[%c0_20, %c0_21], %32 {strides = array<i32>} : memref<16x128xi32, #tpu.memory_space<vmem>>, vector<16x128xi32>,
    } else {
    }
    %c0 = arith.constant 0 : index
    %c0_1 = arith.constant 0 : index
    %3 = vector.load %arg3[%c0, %c0_1] : memref<16x128xf32, #tpu.memory_space<vmem>>, vector<16x128xf32>
    %c0_2 = arith.constant 0 : index
    %c0_3 = arith.constant 0 : index
    %4 = vector.load %arg2[%c0_2, %c0_3] : memref<16x128xf32, #tpu.memory_space<vmem>>, vector<16x128xf32>
    %c1_i32 = arith.constant 1 : i32
    %5 = arith.muli %arg0, %c1_i32 : i32
    %6 = arith.addi %5, %arg1 : i32
    %c16_i32 = arith.constant 16 : i32
    %7 = arith.muli %6, %c16_i32 : i32
    %8 = tpu.iota {dimensions = array<i32: 0>} : vector<16x128xi32>
    %9 = vector.broadcast %7 : i32 to vector<16x128xi32>
    %10 = arith.addi %9, %8 : vector<16x128xi32>
    %cst = arith.constant 0.000000e+00 : f32
    %11 = vector.broadcast %cst : f32 to vector<16x128xf32>
    %12 = arith.cmpf ogt, %3, %11 : vector<16x128xf32>
    %c16_i32_4 = arith.constant 16 : i32
    %13 = vector.broadcast %c16_i32_4 : i32 to vector<16x128xi32>
    %14 = arith.cmpi slt, %10, %13 : vector<16x128xi32>
    %15 = arith.andi %12, %14 : vector<16x128xi1>
    %16 = arith.subf %3, %4 : vector<16x128xf32>
    %17 = math.absf %16 : vector<16x128xf32>
    %c0_5 = arith.constant 0 : index
    %c0_6 = arith.constant 0 : index
    %18 = vector.load %arg6[%c0_5, %c0_6] : memref<16x128xf32, #tpu.memory_space<vmem>>, vector<16x128xf32>
    %cst_7 = arith.constant 0.000000e+00 : f32
    %19 = vector.broadcast %cst_7 : f32 to vector<16x128xf32>
    %20 = arith.select %15, %17, %19 : vector<16x128xi1>, vector<16x128xf32>
    %21 = arith.addf %18, %20 : vector<16x128xf32>
    %c0_8 = arith.constant 0 : index
    %c0_9 = arith.constant 0 : index
    %22 = vector.load %arg6[%c0_8, %c0_9] : memref<16x128xf32, #tpu.memory_space<vmem>>, vector<16x128xf32>
    tpu.vector_store %arg6[%c0_8, %c0_9], %21 {strides = array<i32>} : memref<16x128xf32, #tpu.memory_space<vmem>>, vector<16x128xf32>,
    %c0_10 = arith.constant 0 : index
    %c0_11 = arith.constant 0 : index
    %23 = vector.load %arg7[%c0_10, %c0_11] : memref<16x128xi32, #tpu.memory_space<vmem>>, vector<16x128xi32>
    %24 = arith.extui %15 : vector<16x128xi1> to vector<16x128xi32>
    %25 = arith.addi %23, %24 : vector<16x128xi32>
    %c0_12 = arith.constant 0 : index
    %c0_13 = arith.constant 0 : index
    %26 = vector.load %arg7[%c0_12, %c0_13] : memref<16x128xi32, #tpu.memory_space<vmem>>, vector<16x128xi32>
    tpu.vector_store %arg7[%c0_12, %c0_13], %25 {strides = array<i32>} : memref<16x128xi32, #tpu.memory_space<vmem>>, vector<16x128xi32>,
    %c0_i32_14 = arith.constant 0 : i32
    %27 = arith.cmpi eq, %arg1, %c0_i32_14 : i32
    %28 = arith.extui %27 : i1 to i32
    %c0_i32_15 = arith.constant 0 : i32
    %29 = arith.cmpi ne, %28, %c0_i32_15 : i32
    scf.if %29 {
      %c0_16 = arith.constant 0 : index
      %c0_17 = arith.constant 0 : index
      %30 = vector.load %arg6[%c0_16, %c0_17] : memref<16x128xf32, #tpu.memory_space<vmem>>, vector<16x128xf32>
      %31 = vector.shape_cast %30 : vector<16x128xf32> to vector<1x16x128xf32>
      %cst_18 = arith.constant dense<0.000000e+00> : vector<1xf32>
      %32 = vector.multi_reduction <add>, %31, %cst_18 [1, 2] : vector<1x16x128xf32> to vector<1xf32>
      %33 = vector.shape_cast %32 : vector<1xf32> to vector<1x1x1xf32>
      %34 = vector.extract %33[0, 0, 0] : f32 from vector<1x1x1xf32>
      %35 = vector.broadcast %34 : f32 to vector<8x128xf32>
      %c0_19 = arith.constant 0 : index
      %c0_20 = arith.constant 0 : index
      %36 = vector.load %arg4[%c0_19, %c0_20] : memref<8x128xf32, #tpu.memory_space<vmem>>, vector<8x128xf32>
      tpu.vector_store %arg4[%c0_19, %c0_20], %35 {strides = array<i32>} : memref<8x128xf32, #tpu.memory_space<vmem>>, vector<8x128xf32>,
      %c0_21 = arith.constant 0 : index
      %c0_22 = arith.constant 0 : index
      %37 = vector.load %arg7[%c0_21, %c0_22] : memref<16x128xi32, #tpu.memory_space<vmem>>, vector<16x128xi32>
      %38 = vector.shape_cast %37 : vector<16x128xi32> to vector<1x16x128xi32>
      %cst_23 = arith.constant dense<0> : vector<1xi32>
      %39 = vector.multi_reduction <add>, %38, %cst_23 [1, 2] : vector<1x16x128xi32> to vector<1xi32>
      %40 = vector.shape_cast %39 : vector<1xi32> to vector<1x1x1xi32>
      %41 = vector.extract %40[0, 0, 0] : i32 from vector<1x1x1xi32>
      %42 = vector.broadcast %41 : i32 to vector<8x128xi32>
      %c0_24 = arith.constant 0 : index
      %c0_25 = arith.constant 0 : index
      %43 = vector.load %arg5[%c0_24, %c0_25] : memref<8x128xi32, #tpu.memory_space<vmem>>, vector<8x128xi32>
      tpu.vector_store %arg5[%c0_24, %c0_25], %42 {strides = array<i32>} : memref<8x128xi32, #tpu.memory_space<vmem>>, vector<8x128xi32>,
    } else {
    }
    return
  }
  func.func @transform_0(%arg0: i32, %arg1: i32) -> (i32, i32) {
    %c1_i32 = arith.constant 1 : i32
    %0 = arith.muli %arg0, %c1_i32 : i32
    %1 = arith.addi %0, %arg1 : i32
    %c0_i32 = arith.constant 0 : i32
    %2 = arith.minsi %1, %c0_i32 : i32
    %c0_i32_0 = arith.constant 0 : i32
    %c0_i32_1 = arith.constant 0 : i32
    return %2, %c0_i32_0 : i32, i32
  }
  func.func @transform_1(%arg0: i32, %arg1: i32) -> (i32, i32) {
    %c1_i32 = arith.constant 1 : i32
    %0 = arith.muli %arg0, %c1_i32 : i32
    %1 = arith.addi %0, %arg1 : i32
    %c0_i32 = arith.constant 0 : i32
    %2 = arith.minsi %1, %c0_i32 : i32
    %c0_i32_0 = arith.constant 0 : i32
    %c0_i32_1 = arith.constant 0 : i32
    return %2, %c0_i32_0 : i32, i32
  }
  func.func @transform_2(%arg0: i32, %arg1: i32) -> (i32, i32) {
    %c0_i32 = arith.constant 0 : i32
    %c0_i32_0 = arith.constant 0 : i32
    return %arg0, %c0_i32 : i32, i32
  }
  func.func @transform_3(%arg0: i32, %arg1: i32) -> (i32, i32) {
    %c0_i32 = arith.constant 0 : i32
    %c0_i32_0 = arith.constant 0 : i32
    return %arg0, %c0_i32 : i32, i32
  }
}

</mosaic_0001>

<bundles_post_ra>
// kernel: tpu_custom_call.1
= control target key start
LH: loop header
LB: loop body
LE: loop exit
PB: predicated region body
PF: predicated region fallthrough
CT: control target
= control target key end

     0   :  { %9 = vsyncpa [#allocation5], 0  ;;  %s366_s0 = inlined_call_operand.hbm [shape: f32[16,128], index: 0, kind: input, shape index: {}]   ;;  %s367_s1 = inlined_call_operand.hbm [shape: f32[16,128], index: 1, kind: input, shape index: {}]   ;;  %s368_s2 = inlined_call_operand.hbm [shape: f32[8,128], index: 2, kind: output, shape index: {0}]   ;;  %s369_s3 = inlined_call_operand.hbm [shape: s32[8,128], index: 3, kind: output, shape index: {1}]  }
   0x1   :  { %10 = vsyncpa [#allocation8], 0 }
   0x2   :  { %11 = vsyncpa [#allocation6], 0 }
   0x3   :  { %12 = vsyncpa [#allocation11], 0  ;;  %s291_s12 = smov [#allocation4]   ;;  %s195_s16 = scalar_lea.hbm %s366_s0, 256 }
   0x4   :  { %s24_s13 = sshll.u32 %s291_s12, 4  ;;  %p196_p0 = scmp.ne.s32.totalorder %s366_s0, %s195_s16  ;;  %s25_s13 = int_to_ptr.vmem [resolvable:$true] %s24_s13 }
   0x5   :  { %p199_p1 = scmp.lt.u32.totalorder %s195_s16, %s366_s0 }
   0x7   :  { %p201_p2 = pnand %p199_p1, %p196_p0 }
   0x9   :  { %204 = shalt.err (!%p201_p2)
}
   0xa   :  { %s205_s21 = scalar_lea.vmem %s25_s13, 256  ;;  %p210_p4 = scmp.lt.s32.totalorder %s25_s13, %s25_s13 }
   0xb   :  { %p206_p3 = scmp.ne.s32.totalorder %s25_s13, %s205_s21  ;;  %p211_p5 = scmp.lt.s32.totalorder %s205_s21, %s205_s21 }
   0xd   :  { %p212_p6 = por %p211_p5, %p210_p4 }
   0xf   :  { %p213_p7 = pnand %p212_p6, %p206_p3 }
  0x11   :  { %216 = shalt.err (!%p213_p7)
}
  0x12   :  { %s292_s22 = smov 128   ;;  %s293_s23 = smov 8  }
  0x13   :  { %30 = dma.hbm_to_vmem [thread:$0]  %s366_s0, 256, %s25_s13, [#allocation5], %s292_s22, %s292_s22, %s293_s23  }
  0x14   :  { %s294_s26 = smov [#allocation7]   ;;  %s217_s30 = scalar_lea.hbm %s367_s1, 256 }
  0x15   :  { %s42_s27 = sshll.u32 %s294_s26, 4  ;;  %p218_p8 = scmp.ne.s32.totalorder %s367_s1, %s217_s30  ;;  %s43_s27 = int_to_ptr.vmem [resolvable:$true] %s42_s27 }
  0x16   :  { %p221_p9 = scmp.lt.u32.totalorder %s217_s30, %s367_s1 }
  0x18   :  { %p223_p10 = pnand %p221_p9, %p218_p8 }
  0x1a   :  { %226 = shalt.err (!%p223_p10)
}
  0x1b   :  { %s227_s8 = scalar_lea.vmem %s43_s27, 256  ;;  %p232_p12 = scmp.lt.s32.totalorder %s43_s27, %s43_s27 }
  0x1c   :  { %p228_p11 = scmp.ne.s32.totalorder %s43_s27, %s227_s8  ;;  %p233_p13 = scmp.lt.s32.totalorder %s227_s8, %s227_s8 }
  0x1e   :  { %p234_p0 = por %p233_p13, %p232_p12 }
  0x20   :  { %p235_p1 = pnand %p234_p0, %p228_p11 }
  0x22   :  { %238 = shalt.err (!%p235_p1)
}
  0x23   :  { %48 = dma.hbm_to_vmem [thread:$0]  %s367_s1, 256, %s43_s27, [#allocation8], %s292_s22, %s292_s22, %s293_s23  }
  0x24   :  { %283 = dma.done.wait [#allocation5], 256  }
  0x25   :  { %284 = vsyncadd [#allocation5], 4294967040 }
  0x26   :  { %285 = dma.done.wait [#allocation8], 256  }
  0x27   :  { %286 = vsyncadd [#allocation8], 4294967040  ;;  %v71_v0 = vld [vmem:[#allocation7] sm:$0xff]  ;;  %v72_v1 = vld [vmem:[#allocation7 + $0x8] sm:$0xff]  ;;  %v295_v5 = vmov 0   ;;  %s296_s1 = smov [#allocation9]  }
  0x28   :  { %v73_v2 = vld [vmem:[#allocation4] sm:$0xff]  ;;  %vm83_vm0 = vcmp.gt.f32.partialorder %v71_v0, 0.0  ;;  %vm84_vm1 = vcmp.gt.f32.partialorder %v72_v1, 0.0  ;;  %v74_v3 = vld [vmem:[#allocation4 + $0x8] sm:$0xff]  ;;  %s156_s10 = sshll.u32 %s296_s1, 4  ;;  %s157_s10 = int_to_ptr.vmem [resolvable:$true] %s156_s10 }
  0x29   :  { %v89_v4 = vsub.f32 %v71_v0, %v73_v2  ;;  %v103_v6 = vsel %vm83_vm0, 1, %v295_v5  ;;  %v104_v7 = vsel %vm84_vm1, 1, %v295_v5  ;;  %v90_v8 = vsub.f32 %v72_v1, %v74_v3  ;;  %s239_s12 = scalar_lea.vmem %s157_s10, 128  ;;  %p244_p3 = scmp.lt.s32.totalorder %s157_s10, %s157_s10 }
  0x2a   :  { %v128_v9 = vadd.s32 %v104_v7, %v103_v6  ;;  %p240_p2 = scmp.ne.s32.totalorder %s157_s10, %s239_s12  ;;  %p245_p4 = scmp.lt.s32.totalorder %s239_s12, %s239_s12 }
  0x2b   :  { %v91_v10 = vand.u32 2147483647, %v89_v4  ;;  %v92_v11 = vand.u32 2147483647, %v90_v8 }
  0x2c   :  { %v130_v12 = vshrl.u32 %v128_v9, 16  ;;  %v129_v14 = vand.u32 65535, %v128_v9  ;;  %p246_p5 = por %p245_p4, %p244_p3 }
  0x2d   :  { %v95_v13 = vsel %vm83_vm0, %v91_v10, 0.0  ;;  %v96_v15 = vsel %vm84_vm1, %v92_v11, 0.0 }
  0x2e   :  { %v132_v16 = vcvt.s32.f32 %v130_v12  ;;  %v114_v17 = vadd.f32 %v96_v15, %v95_v13  ;;  %v131_v18 = vcvt.s32.f32 %v129_v14  ;;  %p247_p6 = pnand %p246_p5, %p240_p2 }
  0x30   :  { %135 = vadd.xlane.f32.xlu0 %v132_v16  ;;  %115 = vadd.xlane.f32.xlu1 %v114_v17 }
  0x34   :  { %133 = vadd.xlane.f32.xlu0 %v131_v18 }
  0xbd   :  { %v136_v19 = vpop.xlane.xlu0 %135  ;;  %v116_v20 = vpop.xlane.xlu1 %115 }
  0xbe   :  { %v138_v21 = vcvt.f32.s32 %v136_v19  ;;  %v117_v22 = vrot.slane %v116_v20, 4 }
  0xc0   :  { %v118_v23 = vadd.f32 %v117_v22, %v116_v20  ;;  %v139_v25 = vshll.u32 %v138_v21, 16 }
  0xc1   :  { %v134_v24 = vpop.xlane.xlu0 %133 }
  0xc2   :  { %v119_v26 = vrot.slane %v118_v23, 2  ;;  %v137_v27 = vcvt.f32.s32 %v134_v24 }
  0xc4   :  { %v140_v28 = vadd.s32 %v139_v25, %v137_v27  ;;  %v120_v29 = vadd.f32 %v119_v26, %v118_v23 }
  0xc6   :  { %v141_v30 = vrot.slane %v140_v28, 4  ;;  %v121_v31 = vrot.slane %v120_v29, 1 }
  0xc8   :  { %v142_v32 = vadd.s32 %v141_v30, %v140_v28  ;;  %v122_v33 = vadd.f32 %v121_v31, %v120_v29 }
  0xca   :  { %184 = vpush %v122_v33  ;;  %v143_v34 = vrot.slane %v142_v32, 2 }
  0xcc   :  { %v144_v35 = vadd.s32 %v143_v34, %v142_v32 }
  0xce   :  { %v145_v36 = vrot.slane %v144_v35, 1 }
  0xd0   :  { %v146_v37 = vadd.s32 %v145_v36, %v144_v35 }
  0xd2   :  { %186 = vpush %v146_v37 }
  0xfb   :  { %s185_s11 = spop %184 }
  0xfc   :  { %v124_v38 = vstv %s185_s11 }
  0xfd   :  { %125 = vst [vmem:[#allocation9] sm:$0xff] %v124_v38 }
  0xfe   :  { %250 = shalt.err (!%p247_p6)
}
  0xff   :  { %s251_s15 = scalar_lea.hbm %s368_s2, 128 }
 0x100   :  { %p252_p7 = scmp.ne.s32.totalorder %s368_s2, %s251_s15  ;;  %p255_p8 = scmp.lt.u32.totalorder %s251_s15, %s368_s2 }
 0x102   :  { %p257_p9 = pnand %p255_p8, %p252_p7 }
 0x104   :  { %260 = shalt.err (!%p257_p9)
}
 0x105   :  { %159 = dma.vmem_to_hbm [thread:$0]  %s157_s10, 128, %s368_s2, [#allocation6]  }
 0x106   :  { %s297_s22 = smov [#allocation10]   ;;  %s187_s24 = spop %186 }
 0x107   :  { %s166_s23 = sshll.u32 %s297_s22, 4  ;;  %v148_v39 = vstv %s187_s24  ;;  %s167_s23 = int_to_ptr.vmem [resolvable:$true] %s166_s23 }
 0x108   :  { %149 = vst [vmem:[#allocation10] sm:$0xff] %v148_v39  ;;  %s261_s25 = scalar_lea.vmem %s167_s23, 128  ;;  %p266_p11 = scmp.lt.s32.totalorder %s167_s23, %s167_s23 }
 0x109   :  { %p262_p10 = scmp.ne.s32.totalorder %s167_s23, %s261_s25  ;;  %p267_p12 = scmp.lt.s32.totalorder %s261_s25, %s261_s25 }
 0x10b   :  { %p268_p13 = por %p267_p12, %p266_p11 }
 0x10d   :  { %p269_p0 = pnand %p268_p13, %p262_p10 }
 0x10f   :  { %272 = shalt.err (!%p269_p0)
}
 0x110   :  { %s273_s28 = scalar_lea.hbm %s369_s3, 128 }
 0x111   :  { %p274_p1 = scmp.ne.s32.totalorder %s369_s3, %s273_s28  ;;  %p277_p2 = scmp.lt.u32.totalorder %s273_s28, %s369_s3 }
 0x113   :  { %p279_p3 = pnand %p277_p2, %p274_p1 }
 0x115   :  { %282 = shalt.err (!%p279_p3)
}
 0x116   :  { %169 = dma.vmem_to_hbm [thread:$0]  %s167_s23, 128, %s369_s3, [#allocation11]  }
 0x117   :  { %287 = dma.done.wait [#allocation6], 128  }
 0x118   :  { %288 = vsyncadd [#allocation6], 4294967168 }
 0x119   :  { %289 = dma.done.wait [#allocation11], 128  }
 0x11a   :  { %290 = vsyncadd [#allocation11], 4294967168 }
 0x11b   :  { %176 = vsyncpa [#allocation5], 1 }
 0x11c   :  { %177 = vsyncpa [#allocation8], 1 }
 0x11d   :  { %178 = vsyncpa [#allocation6], 1 }
 0x11e   :  { %179 = vsyncpa [#allocation11], 1 }

</bundles_post_ra>
